<compile_context>
chip_gen: v6e
topology: v6e:2x2x1
jax: 0.10.0
libtpu: 0.0.40
codegen_flags: <defaults>
</compile_context>

<pallas_src>
import math

import jax
import jax.numpy as jnp
from jax.experimental import pallas as pl
from jax.experimental.pallas import tpu as pltpu


_NEG_BIG = -1e30                    # bias for padded (fake) classes -> exp() == 0
_VMEM_BUDGET = 40 * 1024 * 1024     # target working set (fits v7x's 64 MiB VMEM)
_VMEM_LIMIT = 48 * 1024 * 1024      # scoped limit passed to Mosaic (safe on all chips)


def _round_up(x, m):
    return ((x + m - 1) // m) * m


# --------------------------------------------------------------------------- #
# Kernel
# --------------------------------------------------------------------------- #
def classifier_kernel(x_ref, w1_ref, b1_ref, w2_ref, b2_ref,
                      w3_ref, b3_ref, w4_ref, b4_ref, o_ref):
    """4-layer MLP + softmax on one batch tile (all weights resident in VMEM)."""
    # Cast inside the kernel: input streams from HBM as f32 (4 B/elem) instead
    # of a separate wrapper-side cast pass (8 B/elem total).
    x = x_ref[...].astype(jnp.bfloat16)                              # [TB, D_in]

    h = jnp.dot(x, w1_ref[...], preferred_element_type=jnp.float32) + b1_ref[...]
    h = jnp.maximum(h, 0.0)
    # TODO(synk): nn.Dropout is identity in eval mode; training-mode dropout omitted.

    h = jnp.dot(h.astype(jnp.bfloat16), w2_ref[...],
                preferred_element_type=jnp.float32) + b2_ref[...]
    h = jnp.maximum(h, 0.0)

    h = jnp.dot(h.astype(jnp.bfloat16), w3_ref[...],
                preferred_element_type=jnp.float32) + b3_ref[...]
    h = jnp.maximum(h, 0.0)

    logits = jnp.dot(h.astype(jnp.bfloat16), w4_ref[...],
                     preferred_element_type=jnp.float32) + b4_ref[...]

    # Softmax over the class dim.  Lane-padded classes carry a -1e30 bias so
    # exp() underflows to 0 and the normalization is unaffected.  Exact divide
    # (not approx reciprocal) so rows sum to 1; cost is hidden (mem-bound).
    m = jnp.max(logits, axis=-1, keepdims=True)
    e = jnp.exp(logits - m)
    denom = jnp.sum(e, axis=-1, keepdims=True)
    o_ref[...] = (e / denom).astype(o_ref.dtype)                     # bf16 writeback


# --------------------------------------------------------------------------- #
# One-time parameter preparation (hoisted out of the per-call wrapper)
# --------------------------------------------------------------------------- #
def prepare_params(params, label_dim):
    """Cast weights to bf16 / biases to f32 and lane-pad the class dimension.

    Padded output columns get zero weights and a -1e30 bias so the softmax is
    unchanged.  Returns ((w1,b1),...,(w4,b4)), label_dim."""
    (w1, b1), (w2, b2), (w3, b3), (w4, b4) = params
    l_pad = _round_up(label_dim, 128)
    if l_pad != label_dim:
        w4 = jnp.zeros((w4.shape[0], l_pad), w4.dtype).at[:, :label_dim].set(w4)
        b4 = jnp.full((1, l_pad), _NEG_BIG, jnp.float32).at[:, :label_dim].set(b4)
    prepared = tuple((w.astype(jnp.bfloat16), b.astype(jnp.float32))
                     for w, b in ((w1, b1), (w2, b2), (w3, b3), (w4, b4)))
    # TODO(synk): optional K-padding of d_in to a multiple of 256 (MXU tile) is
    # skipped -- irrelevant while the kernel sits on the memory roofline.
    return prepared, label_dim


# --------------------------------------------------------------------------- #
# Wrapper
# --------------------------------------------------------------------------- #
def _choose_batch_tile(B, batch_tile):
    """Multiple-of-16 batch tile; >=2 grid steps when B is large enough so the
    'parallel' grid axis shards across both v7x TensorCores."""
    if B <= 16:
        return _round_up(B, 16)
    half = _round_up((B + 1) // 2, 16)
    return max(16, min(batch_tile, half))


def classifier_forward(enc_outputs, prepared_params, *, batch_tile=512):
    """enc_outputs: [B, S, H] (or any [B, ...]); returns [B, label_dim] softmax probs."""
    prepared, label_dim = prepared_params
    (w1b, b1f), (w2b, b2f), (w3b, b3f), (w4b, b4f) = prepared
    l_pad = w4b.shape[1]

    B = enc_outputs.shape[0]
    x = enc_outputs.reshape(B, -1)                                   # nn.Flatten()
    d_in = x.shape[1]

    # --- batch tiling: shrink the tile until the double-buffered working set
    #     fits the VMEM budget (matters for large d_in, esp. on v7x's 64 MiB).
    hdims = (w1b.shape[1], w2b.shape[1], w3b.shape[1], l_pad)
    w_bytes = sum(2 * w.size * 2 + 2 * b.size * 4 for w, b in prepared)

    def vmem_estimate(t):
        return (2 * t * d_in * 4          # f32 x tile, double-buffered
                + 2 * t * l_pad * 2       # bf16 output tile, double-buffered
                + 3 * t * max(hdims) * 4  # f32 intermediates headroom
                + w_bytes)                # resident weights/biases

    tb = _choose_batch_tile(B, batch_tile)
    while tb > 16 and vmem_estimate(tb) > _VMEM_BUDGET:
        tb = max(16, _round_up(tb // 2, 16))

    b_pad = _round_up(B, tb)
    if b_pad != B:
        x = jnp.pad(x, ((0, b_pad - B), (0, 0)))                     # ragged tail only
    grid_b = b_pad // tb

    def const_spec(shape):
        # Constant index_map: weight/bias blocks stay resident across grid steps.
        return pl.BlockSpec(shape, lambda i: (0,) * len(shape))

    out = pl.pallas_call(
        classifier_kernel,
        out_shape=jax.ShapeDtypeStruct((b_pad, l_pad), jnp.bfloat16),
        grid=(grid_b,),
        in_specs=[
            pl.BlockSpec((tb, d_in), lambda i: (i, 0)),   # x: tiled over batch (f32)
            const_spec(w1b.shape), const_spec(b1f.shape),
            const_spec(w2b.shape), const_spec(b2f.shape),
            const_spec(w3b.shape), const_spec(b3f.shape),
            const_spec(w4b.shape), const_spec(b4f.shape),
        ],
        out_specs=pl.BlockSpec((tb, l_pad), lambda i: (i, 0)),
        compiler_params=pltpu.CompilerParams(
            dimension_semantics=("parallel",),            # shard batch across TCs (v7x)
            vmem_limit_bytes=_VMEM_LIMIT,
        ),
    )(x, w1b, b1f, w2b, b2f, w3b, b3f, w4b, b4f)

    # dec_logits.view(-1, dec_logits.size(-1)) -> already 2-D; strip padding,
    # upcast the (tiny) sliced result back to f32 for the caller.
    return out[:B, :label_dim].astype(jnp.float32)


# --------------------------------------------------------------------------- #
# Init + reference
# --------------------------------------------------------------------------- #
def init_params(key, classifier_input, classifier_dim, label_dim):
    """nn.Linear default init (U[-1/sqrt(fan_in), 1/sqrt(fan_in)]).
    Weights stored as [in, out]; biases as [1, out] for TPU-friendly 2-D layout."""
    dims = [classifier_input] + list(classifier_dim) + [label_dim]
    params = []
    for i in range(4):
        fan_in, fan_out = dims[i], dims[i + 1]
        key, kw, kb = jax.random.split(key, 3)
        bound = 1.0 / math.sqrt(fan_in)
        w = jax.random.uniform(kw, (fan_in, fan_out), jnp.float32, -bound, bound)
        b = jax.random.uniform(kb, (1, fan_out), jnp.float32, -bound, bound)
        params.append((w, b))
    return params


def reference_forward(enc_outputs, params):
    """Pure-JAX f32 reference (eval-mode forward of the PyTorch module)."""
    x = enc_outputs.reshape(enc_outputs.shape[0], -1)
    (w1, b1), (w2, b2), (w3, b3), (w4, b4) = params
    h = jnp.maximum(x @ w1 + b1, 0.0)
    h = jnp.maximum(h @ w2 + b2, 0.0)
    h = jnp.maximum(h @ w3 + b3, 0.0)
    logits = h @ w4 + b4
    return jax.nn.softmax(logits, axis=-1)


if __name__ == "__main__":
    # Small, module-consistent shapes: batch=2, seq=8, hidden=32 -> classifier_input=256
    B, S, H = 2, 8, 32
    classifier_input = S * H            # 256
    classifier_dim = (128, 64, 32)
    label_dim = 8

    key = jax.random.PRNGKey(0)
    key, kx = jax.random.split(key)
    enc_outputs = jax.random.normal(kx, (B, S, H), dtype=jnp.float32)

    params = init_params(key, classifier_input, classifier_dim, label_dim)
    prepared = prepare_params(params, label_dim)     # one-time param prep

    out = classifier_forward(enc_outputs, prepared)
    out = jax.block_until_ready(out)

    # sanity: shape, softmax rows sum to 1 (bf16 output rounding -> loose atol),
    # matches the f32 reference within bf16-matmul tolerance.
    assert out.shape == (B, label_dim)
    assert jnp.allclose(jnp.sum(out, axis=-1), 1.0, atol=1e-2)
    ref = reference_forward(enc_outputs, params)
    assert jnp.allclose(out, ref, atol=3e-2), "mismatch vs f32 reference"
    print("KERNEL_OK")
</pallas_src>

<mosaic_0001>
module attributes {stable_mosaic.version = 11 : i64} {
  func.func @classifier_kernel(%arg0: i32, %arg1: memref<16x256xf32, #tpu.memory_space<vmem>>, %arg2: memref<256x128xbf16, #tpu.memory_space<vmem>>, %arg3: memref<1x128xf32, #tpu.memory_space<vmem>>, %arg4: memref<128x64xbf16, #tpu.memory_space<vmem>>, %arg5: memref<1x64xf32, #tpu.memory_space<vmem>>, %arg6: memref<64x32xbf16, #tpu.memory_space<vmem>>, %arg7: memref<1x32xf32, #tpu.memory_space<vmem>>, %arg8: memref<32x128xbf16, #tpu.memory_space<vmem>>, %arg9: memref<1x128xf32, #tpu.memory_space<vmem>>, %arg10: memref<16x128xbf16, #tpu.memory_space<vmem>>) attributes {dimension_semantics = [#tpu.dimension_semantics<parallel>], iteration_bounds = array<i64: 1>, scalar_prefetch = 0 : i64, scratch_operands = 0 : i64, tpu.core_type = #tpu.core_type<tc>, window_params = [{transform_indices = @transform_0, window_bounds = array<i64: 16, 256>}, {pipeline_mode = #tpu.pipeline_mode<synchronous>, transform_indices = @transform_1, window_bounds = array<i64: 256, 128>}, {pipeline_mode = #tpu.pipeline_mode<synchronous>, transform_indices = @transform_2, window_bounds = array<i64: 1, 128>}, {pipeline_mode = #tpu.pipeline_mode<synchronous>, transform_indices = @transform_3, window_bounds = array<i64: 128, 64>}, {pipeline_mode = #tpu.pipeline_mode<synchronous>, transform_indices = @transform_4, window_bounds = array<i64: 1, 64>}, {pipeline_mode = #tpu.pipeline_mode<synchronous>, transform_indices = @transform_5, window_bounds = array<i64: 64, 32>}, {pipeline_mode = #tpu.pipeline_mode<synchronous>, transform_indices = @transform_6, window_bounds = array<i64: 1, 32>}, {pipeline_mode = #tpu.pipeline_mode<synchronous>, transform_indices = @transform_7, window_bounds = array<i64: 32, 128>}, {pipeline_mode = #tpu.pipeline_mode<synchronous>, transform_indices = @transform_8, window_bounds = array<i64: 1, 128>}, {transform_indices = @transform_9, window_bounds = array<i64: 16, 128>}]} {
    %c0 = arith.constant 0 : index
    %c0_0 = arith.constant 0 : index
    %0 = vector.load %arg1[%c0, %c0_0] : memref<16x256xf32, #tpu.memory_space<vmem>>, vector<16x256xf32>
    %1 = arith.truncf %0 : vector<16x256xf32> to vector<16x256xbf16>
    %c0_1 = arith.constant 0 : index
    %c0_2 = arith.constant 0 : index
    %2 = vector.load %arg2[%c0_1, %c0_2] : memref<256x128xbf16, #tpu.memory_space<vmem>>, vector<256x128xbf16>
    %cst = arith.constant dense<0.000000e+00> : vector<16x128xf32>
    %3 = tpu.matmul %1, %2, %cst {dimension_numbers = #tpu.dot_dimension_numbers<[1], [0], [0], [1], [0, 0, 1, 1], [], []>} : vector<16x256xbf16>, vector<256x128xbf16>, vector<16x128xf32> -> vector<16x128xf32>
    %c0_3 = arith.constant 0 : index
    %c0_4 = arith.constant 0 : index
    %4 = vector.load %arg3[%c0_3, %c0_4] : memref<1x128xf32, #tpu.memory_space<vmem>>, vector<1x128xf32>
    %5 = vector.broadcast %4 : vector<1x128xf32> to vector<16x128xf32>
    %6 = arith.addf %3, %5 : vector<16x128xf32>
    %cst_5 = arith.constant 0.000000e+00 : f32
    %7 = vector.broadcast %cst_5 : f32 to vector<16x128xf32>
    %8 = arith.maximumf %6, %7 : vector<16x128xf32>
    %9 = arith.truncf %8 : vector<16x128xf32> to vector<16x128xbf16>
    %c0_6 = arith.constant 0 : index
    %c0_7 = arith.constant 0 : index
    %10 = vector.load %arg4[%c0_6, %c0_7] : memref<128x64xbf16, #tpu.memory_space<vmem>>, vector<128x64xbf16>
    %cst_8 = arith.constant dense<0.000000e+00> : vector<16x64xf32>
    %11 = tpu.matmul %9, %10, %cst_8 {dimension_numbers = #tpu.dot_dimension_numbers<[1], [0], [0], [1], [0, 0, 1, 1], [], []>} : vector<16x128xbf16>, vector<128x64xbf16>, vector<16x64xf32> -> vector<16x64xf32>
    %c0_9 = arith.constant 0 : index
    %c0_10 = arith.constant 0 : index
    %12 = vector.load %arg5[%c0_9, %c0_10] : memref<1x64xf32, #tpu.memory_space<vmem>>, vector<1x64xf32>
    %13 = vector.broadcast %12 : vector<1x64xf32> to vector<16x64xf32>
    %14 = arith.addf %11, %13 : vector<16x64xf32>
    %cst_11 = arith.constant 0.000000e+00 : f32
    %15 = vector.broadcast %cst_11 : f32 to vector<16x64xf32>
    %16 = arith.maximumf %14, %15 : vector<16x64xf32>
    %17 = arith.truncf %16 : vector<16x64xf32> to vector<16x64xbf16>
    %c0_12 = arith.constant 0 : index
    %c0_13 = arith.constant 0 : index
    %18 = vector.load %arg6[%c0_12, %c0_13] : memref<64x32xbf16, #tpu.memory_space<vmem>>, vector<64x32xbf16>
    %cst_14 = arith.constant dense<0.000000e+00> : vector<16x32xf32>
    %19 = tpu.matmul %17, %18, %cst_14 {dimension_numbers = #tpu.dot_dimension_numbers<[1], [0], [0], [1], [0, 0, 1, 1], [], []>} : vector<16x64xbf16>, vector<64x32xbf16>, vector<16x32xf32> -> vector<16x32xf32>
    %c0_15 = arith.constant 0 : index
    %c0_16 = arith.constant 0 : index
    %20 = vector.load %arg7[%c0_15, %c0_16] : memref<1x32xf32, #tpu.memory_space<vmem>>, vector<1x32xf32>
    %21 = vector.broadcast %20 : vector<1x32xf32> to vector<16x32xf32>
    %22 = arith.addf %19, %21 : vector<16x32xf32>
    %cst_17 = arith.constant 0.000000e+00 : f32
    %23 = vector.broadcast %cst_17 : f32 to vector<16x32xf32>
    %24 = arith.maximumf %22, %23 : vector<16x32xf32>
    %25 = arith.truncf %24 : vector<16x32xf32> to vector<16x32xbf16>
    %c0_18 = arith.constant 0 : index
    %c0_19 = arith.constant 0 : index
    %26 = vector.load %arg8[%c0_18, %c0_19] : memref<32x128xbf16, #tpu.memory_space<vmem>>, vector<32x128xbf16>
    %cst_20 = arith.constant dense<0.000000e+00> : vector<16x128xf32>
    %27 = tpu.matmul %25, %26, %cst_20 {dimension_numbers = #tpu.dot_dimension_numbers<[1], [0], [0], [1], [0, 0, 1, 1], [], []>} : vector<16x32xbf16>, vector<32x128xbf16>, vector<16x128xf32> -> vector<16x128xf32>
    %c0_21 = arith.constant 0 : index
    %c0_22 = arith.constant 0 : index
    %28 = vector.load %arg9[%c0_21, %c0_22] : memref<1x128xf32, #tpu.memory_space<vmem>>, vector<1x128xf32>
    %29 = vector.broadcast %28 : vector<1x128xf32> to vector<16x128xf32>
    %30 = arith.addf %27, %29 : vector<16x128xf32>
    %cst_23 = arith.constant dense<0xFF800000> : vector<16xf32>
    %31 = vector.multi_reduction <maximumf>, %30, %cst_23 [1] : vector<16x128xf32> to vector<16xf32>
    %32 = vector.shape_cast %31 : vector<16xf32> to vector<16x1xf32>
    %33 = vector.broadcast %32 : vector<16x1xf32> to vector<16x128xf32>
    %34 = arith.subf %30, %33 : vector<16x128xf32>
    %35 = math.exp %34 : vector<16x128xf32>
    %cst_24 = arith.constant dense<0.000000e+00> : vector<16xf32>
    %36 = vector.multi_reduction <add>, %35, %cst_24 [1] : vector<16x128xf32> to vector<16xf32>
    %37 = vector.shape_cast %36 : vector<16xf32> to vector<16x1xf32>
    %38 = vector.broadcast %37 : vector<16x1xf32> to vector<16x128xf32>
    %39 = arith.divf %35, %38 : vector<16x128xf32>
    %40 = arith.truncf %39 : vector<16x128xf32> to vector<16x128xbf16>
    %c0_25 = arith.constant 0 : index
    %c0_26 = arith.constant 0 : index
    %41 = vector.load %arg10[%c0_25, %c0_26] : memref<16x128xbf16, #tpu.memory_space<vmem>>, vector<16x128xbf16>
    tpu.vector_store %arg10[%c0_25, %c0_26], %40 {strides = array<i32>} : memref<16x128xbf16, #tpu.memory_space<vmem>>, vector<16x128xbf16>,
    return
  }
  func.func @transform_0(%arg0: i32) -> (i32, i32) {
    %c0_i32 = arith.constant 0 : i32
    %c0_i32_0 = arith.constant 0 : i32
    return %arg0, %c0_i32 : i32, i32
  }
  func.func @transform_1(%arg0: i32) -> (i32, i32) {
    %c0_i32 = arith.constant 0 : i32
    %c0_i32_0 = arith.constant 0 : i32
    %c0_i32_1 = arith.constant 0 : i32
    return %c0_i32, %c0_i32_0 : i32, i32
  }
  func.func @transform_2(%arg0: i32) -> (i32, i32) {
    %c0_i32 = arith.constant 0 : i32
    %c0_i32_0 = arith.constant 0 : i32
    %c0_i32_1 = arith.constant 0 : i32
    return %c0_i32, %c0_i32_0 : i32, i32
  }
  func.func @transform_3(%arg0: i32) -> (i32, i32) {
    %c0_i32 = arith.constant 0 : i32
    %c0_i32_0 = arith.constant 0 : i32
    %c0_i32_1 = arith.constant 0 : i32
    return %c0_i32, %c0_i32_0 : i32, i32
  }
  func.func @transform_4(%arg0: i32) -> (i32, i32) {
    %c0_i32 = arith.constant 0 : i32
    %c0_i32_0 = arith.constant 0 : i32
    %c0_i32_1 = arith.constant 0 : i32
    return %c0_i32, %c0_i32_0 : i32, i32
  }
  func.func @transform_5(%arg0: i32) -> (i32, i32) {
    %c0_i32 = arith.constant 0 : i32
    %c0_i32_0 = arith.constant 0 : i32
    %c0_i32_1 = arith.constant 0 : i32
    return %c0_i32, %c0_i32_0 : i32, i32
  }
  func.func @transform_6(%arg0: i32) -> (i32, i32) {
    %c0_i32 = arith.constant 0 : i32
    %c0_i32_0 = arith.constant 0 : i32
    %c0_i32_1 = arith.constant 0 : i32
    return %c0_i32, %c0_i32_0 : i32, i32
  }
  func.func @transform_7(%arg0: i32) -> (i32, i32) {
    %c0_i32 = arith.constant 0 : i32
    %c0_i32_0 = arith.constant 0 : i32
    %c0_i32_1 = arith.constant 0 : i32
    return %c0_i32, %c0_i32_0 : i32, i32
  }
  func.func @transform_8(%arg0: i32) -> (i32, i32) {
    %c0_i32 = arith.constant 0 : i32
    %c0_i32_0 = arith.constant 0 : i32
    %c0_i32_1 = arith.constant 0 : i32
    return %c0_i32, %c0_i32_0 : i32, i32
  }
  func.func @transform_9(%arg0: i32) -> (i32, i32) {
    %c0_i32 = arith.constant 0 : i32
    %c0_i32_0 = arith.constant 0 : i32
    return %arg0, %c0_i32 : i32, i32
  }
}

</mosaic_0001>

<bundles_post_ra>
// kernel: tpu_custom_call.1
= control target key start
LH: loop header
LB: loop body
LE: loop exit
PB: predicated region body
PF: predicated region fallthrough
CT: control target
= control target key end

     0   :  { %14 = vsyncpa [#allocation3], 0  ;;  %s948_s0 = inlined_call_operand.hbm [shape: f32[16,256], index: 0, kind: input, shape index: {}]   ;;  %s949_s1 = inlined_call_operand.vmem [shape: bf16[256,128], index: 1, kind: input, shape index: {}]   ;;  %s950_s2 = inlined_call_operand.vmem [shape: f32[1,128], index: 2, kind: input, shape index: {}]   ;;  %s951_s3 = inlined_call_operand.vmem [shape: bf16[128,64], index: 3, kind: input, shape index: {}]   ;;  %s952_s4 = inlined_call_operand.vmem [shape: f32[1,64], index: 4, kind: input, shape index: {}]   ;;  %s953_s5 = inlined_call_operand.vmem [shape: bf16[64,32], index: 5, kind: input, shape index: {}]   ;;  %s954_s6 = inlined_call_operand.vmem [shape: f32[1,32], index: 6, kind: input, shape index: {}]   ;;  %s955_s7 = inlined_call_operand.vmem [shape: bf16[32,128], index: 7, kind: input, shape index: {}]   ;;  %s956_s8 = inlined_call_operand.vmem [shape: f32[1,128], index: 8, kind: input, shape index: {}]   ;;  %s957_s9 = inlined_call_operand.hbm [shape: bf16[16,128], index: 9, kind: output, shape index: {}]  }
   0x1   :  { %15 = vsyncpa [#allocation4], 0  ;;  %s762_s30 = smov [#allocation2]  }
   0x2   :  { %s21_s10 = sshll.u32 %s762_s30, 4  ;;  %s22_s10 = int_to_ptr.vmem [resolvable:$true] %s21_s10 }
   0x3   :  { %s726_s11 = scalar_lea.vmem %s22_s10, 512  ;;  %p731_p1 = scmp.lt.s32.totalorder %s22_s10, %s22_s10 }
   0x4   :  { %p727_p0 = scmp.ne.s32.totalorder %s22_s10, %s726_s11  ;;  %p732_p2 = scmp.lt.s32.totalorder %s726_s11, %s726_s11 }
   0x6   :  { %p733_p3 = por %p732_p2, %p731_p1 }
   0x8   :  { %p734_p4 = pnand %p733_p3, %p727_p0 }
   0xa   :  { %737 = shalt.err (!%p734_p4)
}
   0xb   :  { %s763_s12 = smov 256   ;;  %s764_s13 = smov 16  }
   0xc   :  { %27 = dma.hbm_to_vmem [thread:$0]  %s948_s0, 512, %s22_s10, [#allocation3], %s763_s12, %s763_s12, %s764_s13  }
   0xd   :  { %758 = dma.done.wait [#allocation3], 512  }
   0xe   :  { %759 = vsyncadd [#allocation3], 4294966784  ;;  %v765_v0 = vmov 0.0   ;;  %v680_v1 = vld [vmem:[%s949_s1 + $0x78] sm:$0xff]   ;;  %v682_v3 = vld [vmem:[%s949_s1 + $0x70] sm:$0xff]   ;;  %vm766_vm0 = vmmov 0  }
   0xf   :  { %632 = vmatprep.subr.bf16.mxu1 %v765_v0  ;;  %v681_v2 = vld [vmem:[%s949_s1 + $0x38] sm:$0xff]   ;;  %593 = vmatprep.subr.bf16.mxu0 %v680_v1  ;;  %v683_v4 = vld [vmem:[%s949_s1 + $0x30] sm:$0xff]   ;;  %v684_v5 = vld [vmem:[%s949_s1 + $0x68] sm:$0xff]   ;;  %vm387_vm1 = vcmask 523264   ;;  %vm458_vm2 = vcmask 261120  }
  0x10   :  { %594 = vmatpush3.bf16.msra.mxu0 %v681_v2  ;;  %v685_v6 = vld [vmem:[%s949_s1 + $0x28] sm:$0xff]   ;;  %v686_v7 = vld [vmem:[%s949_s1 + $0x60] sm:$0xff]   ;;  %v688_v9 = vld [vmem:[%s949_s1 + $0x58] sm:$0xff]   ;;  %648 = vmatprep.mubr.msk.bf16.mxu1 %vm766_vm0, %v765_v0 }
  0x11   :  { %595 = vmatprep.subr.bf16.mxu0 %v682_v3  ;;  %v687_v8 = vld [vmem:[%s949_s1 + $0x20] sm:$0xff]   ;;  %v689_v10 = vld [vmem:[%s949_s1 + $0x18] sm:$0xff]   ;;  %v690_v11 = vld [vmem:[%s949_s1 + $0x50] sm:$0xff]  }
  0x12   :  { %v49_v12 = vld [vmem:[#allocation2 + $0x8] sm:$0xff]  ;;  %v51_v13 = vld [vmem:[#allocation2 + $0x18] sm:$0xff]  ;;  %v691_v14 = vld [vmem:[%s949_s1 + $0x10] sm:$0xff]  }
  0x13   :  { %v53_v15 = vpack.c.bf16 %v51_v13, %v49_v12  ;;  %v696_v16 = vld [vmem:[%s951_s3 + $0x38] sm:$0xff]   ;;  %v692_v17 = vld [vmem:[%s949_s1 + $0x48] sm:$0xff]   ;;  %v697_v18 = vld [vmem:[%s951_s3 + $0x30] sm:$0xff]  }
  0x14   :  { %596 = vmatpush3.bf16.msra.mxu0 %v683_v4  ;;  %633 = vmatpush3.bf16.msra.mxu1 %v696_v16  ;;  %v693_v19 = vld [vmem:[%s949_s1 + $0x8] sm:$0xff]   ;;  %v694_v20 = vld [vmem:[%s949_s1 + $0x40] sm:$0xff]   ;;  %v50_v24 = vld [vmem:[#allocation2 + $0x10] sm:$0xff] }
  0x15   :  { %597 = vmatprep.subr.bf16.mxu0 %v684_v5  ;;  %221 = vmatprep.mubr.bf16.mxu0 %v53_v15  ;;  %v698_v21 = vld [vmem:[%s951_s3 + $0x28] sm:$0xff]   ;;  %v695_v22 = vld [vmem:[%s949_s1] sm:$0xff]   ;;  %v700_v27 = vld [vmem:[%s951_s3 + $0x18] sm:$0xff]  }
  0x16   :  { %634 = vmatprep.subr.bf16.mxu1 %v765_v0  ;;  %v48_v23 = vld [vmem:[#allocation2] sm:$0xff]  ;;  %v701_v28 = vld [vmem:[%s951_s3 + $0x10] sm:$0xff]   ;;  %v702_v29 = vld [vmem:[%s951_s3 + $0x8] sm:$0xff]  }
  0x17   :  { %v699_v25 = vld [vmem:[%s951_s3 + $0x20] sm:$0xff]   ;;  %v52_v26 = vpack.c.bf16 %v50_v24, %v48_v23  ;;  %v704_v31 = vld [vmem:[%s953_s5 + $0x18] sm:$0xff]   ;;  %v705_v44 = vld [vmem:[%s953_s5 + $0x10] sm:$0xff]  }
  0x18   :  { %598 = vmatpush3.bf16.msra.mxu0 %v685_v6  ;;  %635 = vmatpush3.bf16.msra.mxu1 %v697_v18  ;;  %v703_v30 = vld [vmem:[%s951_s3] sm:$0xff]   ;;  %v706_v45 = vld [vmem:[%s953_s5 + $0x8] sm:$0xff]  }
  0x19   :  { %599 = vmatprep.subr.bf16.mxu0 %v686_v7  ;;  %636 = vmatprep.subr.bf16.mxu1 %v765_v0  ;;  %v548_v35 = vld [vmem:[%s950_s2] ss:$0 sm:$0xff]  ;;  %v708_v57 = vld [vmem:[%s955_s7 + $0x8] sm:$0xff]  }
  0x1a   :  { %v707_v46 = vld [vmem:[%s953_s5] sm:$0xff]  }
  0x1b   :  { %v565_v47 = vld [vmem:[%s952_s4] ss:$0 sm:$0xff] }
  0x1c   :  { %600 = vmatpush3.bf16.msra.mxu0 %v687_v8  ;;  %637 = vmatpush3.bf16.msra.mxu1 %v698_v21  ;;  %v709_v58 = vld [vmem:[%s955_s7] sm:$0xff]  }
  0x1d   :  { %601 = vmatprep.subr.bf16.mxu0 %v688_v9  ;;  %638 = vmatprep.subr.bf16.mxu1 %v765_v0  ;;  %v574_v59 = vld [vmem:[%s954_s6] ss:$0 sm:$0xff]  ;;  %s767_s6 = smov [#allocation5]  }
  0x1e   :  { %s536_s7 = sshll.u32 %s767_s6, 4  ;;  %s537_s7 = int_to_ptr.vmem [resolvable:$true] %s536_s7 }
  0x1f   :  { %p743_p6 = scmp.lt.s32.totalorder %s537_s7, %s537_s7 }
  0x20   :  { %602 = vmatpush3.bf16.msra.mxu0 %v689_v10  ;;  %639 = vmatpush3.bf16.msra.mxu1 %v699_v25 }
  0x21   :  { %603 = vmatprep.subr.bf16.mxu0 %v690_v11  ;;  %640 = vmatprep.subr.bf16.mxu1 %v765_v0 }
  0x24   :  { %604 = vmatpush3.bf16.msra.mxu0 %v691_v14  ;;  %641 = vmatpush3.bf16.msra.mxu1 %v700_v27 }
  0x25   :  { %605 = vmatprep.subr.bf16.mxu0 %v692_v17  ;;  %642 = vmatprep.subr.bf16.mxu1 %v765_v0 }
  0x28   :  { %606 = vmatpush3.bf16.msra.mxu0 %v693_v19  ;;  %643 = vmatpush3.bf16.msra.mxu1 %v701_v28 }
  0x29   :  { %607 = vmatprep.subr.bf16.mxu0 %v694_v20  ;;  %644 = vmatprep.subr.bf16.mxu1 %v765_v0 }
  0x2c   :  { %608 = vmatpush3.bf16.msra.mxu0 %v695_v22  ;;  %645 = vmatpush3.bf16.msra.mxu1 %v702_v29 }
  0x2d   :  { %652 = vmatprep.subr.bf16.mxu0 %v765_v0  ;;  %646 = vmatprep.subr.bf16.mxu1 %v765_v0 }
  0x2f   :  { %222 = vmatmul.mubr.bf16.vlgmr.msra.gmra.mxu0 %v52_v26 }
  0x30   :  { %647 = vmatpush3.bf16.msra.mxu1 %v703_v30  ;;  %660 = vmatprep.mubr.msk.bf16.mxu0 %vm766_vm0, %v765_v0 }
  0x31   :  { %664 = vmatprep.subr.bf16.mxu1 %v765_v0  ;;  %653 = vmatpush3.bf16.msra.mxu0 %v704_v31 }
  0x32   :  { %654 = vmatprep.subr.bf16.mxu0 %v765_v0 }
  0x35   :  { %655 = vmatpush3.bf16.msra.mxu0 %v705_v44 }
  0x36   :  { %656 = vmatprep.subr.bf16.mxu0 %v765_v0 }
  0x39   :  { %657 = vmatpush3.bf16.msra.mxu0 %v706_v45 }
  0x3a   :  { %658 = vmatprep.subr.bf16.mxu0 %v765_v0 }
  0x3d   :  { %659 = vmatpush3.bf16.msra.mxu0 %v707_v46 }
  0xef   :  { %v609_v32 = vpop.f32.mrf.mxu0 }
  0xf1   :  { %v610_v33 = vpop.f32.mrf.mxu0 }
  0xf2   :  { %v611_v34 = vadd.f32 %v610_v33, %v609_v32 }
  0xf3   :  { %v612_v36 = vpop.f32.mrf.mxu0 }
  0xf4   :  { %v224_v38 = vadd.f32 %v611_v34, %v548_v35 }
  0xf5   :  { %v613_v37 = vpop.f32.mrf.mxu0 }
  0xf6   :  { %v614_v39 = vadd.f32 %v613_v37, %v612_v36  ;;  %v230_v41 = vmax.f32 %v224_v38, 0.0 }
  0xf8   :  { %v227_v40 = vadd.f32 %v614_v39, %v548_v35 }
  0xfa   :  { %v231_v42 = vmax.f32 %v227_v40, 0.0 }
  0xfc   :  { %v232_v43 = vpack.c.bf16 %v231_v42, %v230_v41 }
  0xfe   :  { %649 = vmatmul.mubr.bf16.vlgmr.msra.gmra.mxu1 %v232_v43 }
  0xff   :  { %668 = vmatprep.mubr.msk.bf16.mxu1 %vm766_vm0, %v765_v0  ;;  %665 = vmatpush3.bf16.msra.mxu1 %v708_v57 }
 0x100   :  { %666 = vmatprep.subr.bf16.mxu1 %v765_v0  ;;  %v580_v0 = vld [vmem:[%s956_s8] ss:$0 sm:$0xff]  ;;  %s738_s8 = scalar_lea.vmem %s537_s7, 128 }
 0x101   :  { %p739_p5 = scmp.ne.s32.totalorder %s537_s7, %s738_s8  ;;  %p744_p7 = scmp.lt.s32.totalorder %s738_s8, %s738_s8 }
 0x103   :  { %667 = vmatpush3.bf16.msra.mxu1 %v709_v58  ;;  %p745_p8 = por %p744_p7, %p743_p6 }
 0x105   :  { %p746_p9 = pnand %p745_p8, %p739_p5 }
 0x1be   :  { %v338_v48 = vpop.f32.mrf.mxu1 }
 0x1bf   :  { %v339_v50 = vadd.f32 %v565_v47, %v338_v48 }
 0x1c0   :  { %v650_v49 = vpop.f32.mrf.mxu1 }
 0x1c1   :  { %v345_v54 = vmax.f32 %v339_v50, 0.0 }
 0x1c2   :  { %v341_v51 = vpop.f32.mrf.mxu1 }
 0x1c3   :  { %v342_v52 = vadd.f32 %v565_v47, %v341_v51 }
 0x1c4   :  { %v651_v53 = vpop.f32.mrf.mxu1 }
 0x1c5   :  { %v346_v55 = vmax.f32 %v342_v52, 0.0 }
 0x1c7   :  { %v347_v56 = vpack.c.bf16 %v346_v55, %v345_v54 }
 0x1c9   :  { %661 = vmatmul.mubr.msk.bf16.vlgmr.msra.gmra.mxu0 %vm387_vm1, %v347_v56 }
 0x289   :  { %v425_v60 = vpop.f32.mrf.mxu0 }
 0x28a   :  { %v426_v62 = vadd.f32 %v574_v59, %v425_v60 }
 0x28b   :  { %v662_v61 = vpop.f32.mrf.mxu0 }
 0x28c   :  { %v432_v3 = vmax.f32 %v426_v62, 0.0 }
 0x28d   :  { %v428_v63 = vpop.f32.mrf.mxu0 }
 0x28e   :  { %v429_v1 = vadd.f32 %v574_v59, %v428_v63 }
 0x28f   :  { %v663_v2 = vpop.f32.mrf.mxu0 }
 0x290   :  { %v433_v4 = vmax.f32 %v429_v1, 0.0 }
 0x292   :  { %v434_v5 = vpack.c.bf16 %v433_v4, %v432_v3 }
 0x294   :  { %669 = vmatmul.mubr.msk.bf16.vlgmr.msra.gmra.mxu1 %vm458_vm2, %v434_v5 }
 0x354   :  { %v496_v6 = vpop.f32.mrf.mxu1 }
 0x355   :  { %v497_v7 = vadd.f32 %v580_v0, %v496_v6 }
 0x356   :  { %v670_v8 = vpop.f32.mrf.mxu1 }
 0x357   :  { %503 = vmax.xlane.f32.xlu0 %v497_v7 }
 0x358   :  { %v499_v9 = vpop.f32.mrf.mxu1 }
 0x359   :  { %v500_v10 = vadd.f32 %v580_v0, %v499_v9 }
 0x35a   :  { %v671_v11 = vpop.f32.mrf.mxu1 }
 0x35b   :  { %505 = vmax.xlane.f32.xlu0 %v500_v10 }
 0x3e0   :  { %v504_v12 = vpop.xlane.xlu0 %503 }
 0x3e1   :  { %v507_v13 = vsub.f32 %v497_v7, %v504_v12 }
 0x3e3   :  { %v509_v14 = vmul.f32 1.442695, %v507_v13 }
 0x3e4   :  { %v506_v15 = vpop.xlane.xlu0 %505 }
 0x3e5   :  { %710 = vpow2.f32 %v509_v14  ;;  %v508_v16 = vsub.f32 %v500_v10, %v506_v15 }
 0x3e7   :  { %v511_v17 = vmul.f32 1.442695, %v508_v16 }
 0x3e9   :  { %712 = vpow2.f32 %v511_v17 }
 0x3f2   :  { %v711_v18 = vpop.eup %710 }
 0x3f3   :  { %513 = vadd.xlane.f32.xlu1 %v711_v18 }
 0x3f6   :  { %v713_v19 = vpop.eup %712 }
 0x3f7   :  { %515 = vadd.xlane.f32.xlu1 %v713_v19 }
 0x47c   :  { %v514_v20 = vpop.xlane.xlu1 %513 }
 0x47d   :  { %714 = vrcp.f32 %v514_v20 }
 0x480   :  { %v516_v21 = vpop.xlane.xlu1 %515 }
 0x481   :  { %716 = vrcp.f32 %v516_v21 }
 0x48a   :  { %v715_v22 = vpop.eup %714 }
 0x48b   :  { %v518_v24 = vmul.f32 %v715_v22, %v711_v18 }
 0x48e   :  { %v717_v23 = vpop.eup %716 }
 0x48f   :  { %v520_v25 = vmul.f32 %v717_v23, %v713_v19 }
 0x491   :  { %v591_v26 = vpack.c.bf16 %v520_v25, %v518_v24 }
 0x493   :  { %592 = vst [vmem:[#allocation5] sm:$0xff] %v591_v26  }
 0x494   :  { %749 = shalt.err (!%p746_p9)
}
 0x495   :  { %s768_s12 = smov 64   ;;  %s769_s13 = smov 4  }
 0x496   :  { %542 = dma.vmem_to_hbm [thread:$0]  %s537_s7, 128, %s957_s9, [#allocation4], %s768_s12, %s768_s12, %s769_s13  }
 0x497   :  { %760 = dma.done.wait [#allocation4], 128  }
 0x498   :  { %761 = vsyncadd [#allocation4], 4294967168 }
 0x499   :  { %546 = vsyncpa [#allocation3], 1 }
 0x49a   :  { %547 = vsyncpa [#allocation4], 1 }

</bundles_post_ra>
